<compile_context>
chip_gen: v5e
topology: v5e:2x2
jax: 0.10.0
libtpu: 0.0.40
codegen_flags: <defaults>
</compile_context>

<pallas_src>
import jax
import jax.numpy as jnp
from jax import lax
from jax.experimental import pallas as pl
from jax.experimental.pallas import tpu as pltpu


def _round_up(n, m):
    return ((n + m - 1) // m) * m


def linear_add_kernel(x1_ref, wt_ref, b_ref, x2_ref, o_ref, x1p_ref):
    # x1: (B, IN) f32, wt: (IN_P, OUT_P) bf16 (pre-padded/transposed), b: (1, OUT) f32,
    # x2: (B, OUT) f32, o: (B, OUT) f32, x1p: (B, IN_P) f32 scratch.
    _, IN = x1_ref.shape
    OUT = o_ref.shape[1]

    # Zero-extend x1 to the 128-lane boundary inside VMEM (one masked store).
    x1p_ref[...] = jnp.zeros_like(x1p_ref)
    x1p_ref[:, :IN] = x1_ref[...]

    # Aligned (B, IN_P) x (IN_P, OUT_P) MXU matmul: bf16 inputs, f32 accumulation.
    # Weight is already transposed, so contract lhs dim 1 with rhs dim 0 (no vxpose).
    y = lax.dot_general(
        x1p_ref[...].astype(wt_ref.dtype),
        wt_ref[...],
        dimension_numbers=(((1,), (0,)), ((), ())),
        preferred_element_type=jnp.float32,
    )

    # f32 epilogue on the logical OUT lanes; masked vst to the (B, OUT) output.
    o_ref[...] = (y[:, :OUT] + b_ref[...] + x2_ref[...]).astype(o_ref.dtype)


def prepare_params(w, b, *, weight_dtype=jnp.bfloat16):
    """One-time (model-init) parameter prep.

    w: (OUT, IN) in torch.nn.Linear.weight layout, b: (OUT,) or (1, OUT).
    Returns wt: (IN_P, OUT_P) weight_dtype (transposed, zero-padded), b2: (1, OUT) f32.
    """
    OUT, IN = w.shape
    IN_P = _round_up(IN, 128)
    OUT_P = _round_up(OUT, 128)
    wt = jnp.zeros((IN_P, OUT_P), weight_dtype)
    wt = wt.at[:IN, :OUT].set(w.T.astype(weight_dtype))
    b2 = jnp.asarray(b, jnp.float32).reshape(1, OUT)
    return wt, b2


def linear_add(x1, wt, b2, x2):
    """y = x1 @ W.T + b + x2, with (wt, b2) from prepare_params."""
    B, IN = x1.shape
    IN_P, OUT_P = wt.shape
    OUT = b2.shape[1]

    bytes_accessed = (
        x1.size * x1.dtype.itemsize
        + wt.size * wt.dtype.itemsize
        + b2.size * b2.dtype.itemsize
        + x2.size * x2.dtype.itemsize
        + B * OUT * x1.dtype.itemsize
    )

    return pl.pallas_call(
        linear_add_kernel,
        out_shape=jax.ShapeDtypeStruct((B, OUT), x1.dtype),
        in_specs=[
            pl.BlockSpec(memory_space=pltpu.MemorySpace.VMEM),  # x1
            pl.BlockSpec(memory_space=pltpu.MemorySpace.VMEM),  # wt (padded, bf16)
            pl.BlockSpec(memory_space=pltpu.MemorySpace.VMEM),  # bias
            pl.BlockSpec(memory_space=pltpu.MemorySpace.VMEM),  # x2
        ],
        out_specs=pl.BlockSpec(memory_space=pltpu.MemorySpace.VMEM),
        scratch_shapes=[pltpu.VMEM((B, IN_P), jnp.float32)],
        input_output_aliases={3: 0},  # x2 buffer reused for the output
        cost_estimate=pl.CostEstimate(
            flops=2 * B * IN_P * OUT_P,
            transcendentals=0,
            bytes_accessed=int(bytes_accessed),
        ),
    )(x1, wt, b2, x2)


if __name__ == "__main__":
    key = jax.random.PRNGKey(0)
    k_x1, k_x2, k_w, k_b = jax.random.split(key, 4)

    B, IN, OUT = 1, 100, 100

    x1 = jax.random.normal(k_x1, (B, IN), dtype=jnp.float32)
    x2 = jax.random.normal(k_x2, (B, OUT), dtype=jnp.float32)

    # Deterministic "nn.Linear(100, 100)" parameters (Kaiming-uniform-like bounds).
    bound = 1.0 / (IN ** 0.5)
    w = jax.random.uniform(k_w, (OUT, IN), jnp.float32, minval=-bound, maxval=bound)
    b = jax.random.uniform(k_b, (OUT,), jnp.float32, minval=-bound, maxval=bound)

    # Pure-JAX f32 reference (computed before the call; x2 is aliased to the output).
    ref = x1 @ w.T + b[None, :] + x2

    wt, b2 = prepare_params(w, b)          # one-time model-init prep (padded bf16 weight)
    out = linear_add(x1, wt, b2, x2)
    jax.block_until_ready(out)

    assert out.shape == (B, OUT)
    # bf16 weight/activation feed the MXU -> compare with bf16-level tolerance.
    max_err = float(jnp.max(jnp.abs(out - ref)))
    assert jnp.allclose(out, ref, atol=5e-2, rtol=5e-2), max_err

    print("KERNEL_OK")
</pallas_src>

<mosaic_0001>
module attributes {stable_mosaic.version = 11 : i64} {
  func.func @linear_add_kernel(%arg0: memref<1x100xf32, #tpu.memory_space<vmem>>, %arg1: memref<128x128xbf16, #tpu.memory_space<vmem>>, %arg2: memref<1x100xf32, #tpu.memory_space<vmem>>, %arg3: memref<1x100xf32, #tpu.memory_space<vmem>>, %arg4: memref<1x100xf32, #tpu.memory_space<vmem>>, %arg5: memref<1x128xf32, #tpu.memory_space<vmem>>) attributes {dimension_semantics = [], scalar_prefetch = 0 : i64, scratch_operands = 1 : i64, tpu.core_type = #tpu.core_type<tc>} {
    %cst = arith.constant 0.000000e+00 : f32
    %0 = vector.broadcast %cst : f32 to vector<1x128xf32>
    %c0 = arith.constant 0 : index
    %c0_0 = arith.constant 0 : index
    %1 = vector.load %arg5[%c0, %c0_0] : memref<1x128xf32, #tpu.memory_space<vmem>>, vector<1x128xf32>
    tpu.vector_store %arg5[%c0, %c0_0], %0 {strides = array<i32>} : memref<1x128xf32, #tpu.memory_space<vmem>>, vector<1x128xf32>,
    %c0_1 = arith.constant 0 : index
    %c0_2 = arith.constant 0 : index
    %2 = vector.load %arg0[%c0_1, %c0_2] : memref<1x100xf32, #tpu.memory_space<vmem>>, vector<1x100xf32>
    %c0_3 = arith.constant 0 : index
    %c0_4 = arith.constant 0 : index
    %3 = vector.load %arg5[%c0_3, %c0_4] : memref<1x128xf32, #tpu.memory_space<vmem>>, vector<1x100xf32>
    tpu.vector_store %arg5[%c0_3, %c0_4], %2 {strides = array<i32>} : memref<1x128xf32, #tpu.memory_space<vmem>>, vector<1x100xf32>,
    %c0_5 = arith.constant 0 : index
    %c0_6 = arith.constant 0 : index
    %4 = vector.load %arg5[%c0_5, %c0_6] : memref<1x128xf32, #tpu.memory_space<vmem>>, vector<1x128xf32>
    %5 = arith.truncf %4 : vector<1x128xf32> to vector<1x128xbf16>
    %c0_7 = arith.constant 0 : index
    %c0_8 = arith.constant 0 : index
    %6 = vector.load %arg1[%c0_7, %c0_8] : memref<128x128xbf16, #tpu.memory_space<vmem>>, vector<128x128xbf16>
    %cst_9 = arith.constant dense<0.000000e+00> : vector<1x128xf32>
    %7 = tpu.matmul %5, %6, %cst_9 {dimension_numbers = #tpu.dot_dimension_numbers<[1], [0], [0], [1], [0, 0, 1, 1], [], []>} : vector<1x128xbf16>, vector<128x128xbf16>, vector<1x128xf32> -> vector<1x128xf32>
    %8 = vector.extract_strided_slice %7 {offsets = [0, 0], sizes = [1, 100], strides = [1, 1]} : vector<1x128xf32> to vector<1x100xf32>
    %c0_10 = arith.constant 0 : index
    %c0_11 = arith.constant 0 : index
    %9 = vector.load %arg2[%c0_10, %c0_11] : memref<1x100xf32, #tpu.memory_space<vmem>>, vector<1x100xf32>
    %10 = arith.addf %8, %9 : vector<1x100xf32>
    %c0_12 = arith.constant 0 : index
    %c0_13 = arith.constant 0 : index
    %11 = vector.load %arg3[%c0_12, %c0_13] : memref<1x100xf32, #tpu.memory_space<vmem>>, vector<1x100xf32>
    %12 = arith.addf %10, %11 : vector<1x100xf32>
    %c0_14 = arith.constant 0 : index
    %c0_15 = arith.constant 0 : index
    %13 = vector.load %arg4[%c0_14, %c0_15] : memref<1x100xf32, #tpu.memory_space<vmem>>, vector<1x100xf32>
    tpu.vector_store %arg4[%c0_14, %c0_15], %12 {strides = array<i32>} : memref<1x100xf32, #tpu.memory_space<vmem>>, vector<1x100xf32>,
    return
  }
}

</mosaic_0001>

<bundles_post_ra>
// kernel: tpu_custom_call.1
= control target key start
LH: loop header
LB: loop body
LE: loop exit
PB: predicated region body
PF: predicated region fallthrough
CT: control target
= control target key end

     0   :  { %9 = vsyncpa [#allocation4], 0  ;;  %s326_s0 = inlined_call_operand.vmem [shape: f32[1,100], index: 0, kind: input, shape index: {}]   ;;  %s327_s1 = inlined_call_operand.hbm [shape: bf16[128,128], index: 1, kind: input, shape index: {}]   ;;  %s328_s2 = inlined_call_operand.vmem [shape: f32[1,100], index: 2, kind: input, shape index: {}]   ;;  %s329_s3 = inlined_call_operand.hbm [shape: f32[1,100], index: 3, kind: input, shape index: {}, may-alias: {3,4}]   ;;  %s330_s4 = inlined_call_operand.hbm [shape: f32[1,100], index: 4, kind: output, shape index: {}, may-alias: {3,4}]  }
   0x1   :  { %10 = vsyncpa [#allocation7], 0 }
   0x2   :  { %11 = vsyncpa [#allocation5], 0  ;;  %s18_s17 = sshll.u32 %s327_s1, 4  ;;  %s278_s18 = smov [#allocation3]   ;;  %s19_s17 = int_to_ptr.hbm [resolvable:$true] %s18_s17 }
   0x3   :  { %s20_s19 = sshll.u32 %s278_s18, 4  ;;  %s34_s22 = sshll.u32 %s329_s3, 4  ;;  %s21_s19 = int_to_ptr.vmem [resolvable:$true] %s20_s19  ;;  %s35_s22 = int_to_ptr.hbm [resolvable:$true] %s34_s22 }
   0x4   :  { %s279_s23 = smov 64   ;;  %s280_s24 = smov 4  }
   0x5   :  { %26 = dma.hbm_to_vmem [thread:$0]  %s19_s17, 1024, %s21_s19, [#allocation4], %s279_s23, %s279_s23, %s280_s24  }
   0x6   :  { %s281_s25 = smov [#allocation6]  }
   0x7   :  { %s36_s26 = sshll.u32 %s281_s25, 4  ;;  %s37_s26 = int_to_ptr.vmem [resolvable:$true] %s36_s26 }
   0x8   :  { %39 = dma.hbm_to_vmem [thread:$0]  %s35_s22, 16, %s37_s26, [#allocation7]  }
   0x9   :  { %272 = dma.done.wait [#allocation4], 1024  }
   0xa   :  { %273 = vsyncadd [#allocation4], 4294966272 }
   0xb   :  { %274 = dma.done.wait [#allocation7], 16  }
   0xc   :  { %275 = vsyncadd [#allocation7], 4294967280  ;;  %v282_v0 = vmov 0.0   ;;  %v193_v1 = vld [vmem:[#allocation3 + $0x38] sm:$0xff]  ;;  %vm50_vm0 = vcmask 811008   ;;  %v192_v2 = vld [vmem:[#allocation3 + $0x30] sm:$0xff] }
   0xd   :  { %48 = vst [vmem:[#allocation2] sm:$0x1] %v282_v0  ;;  %118 = vmatpush.bf16.msra.mxu0 %v193_v1  ;;  %v49_v3 = vld [vmem:[%s326_s0] sm:$0x1]  ;;  %v191_v4 = vld [vmem:[#allocation3 + $0x28] sm:$0xff]  ;;  %v190_v5 = vld [vmem:[#allocation3 + $0x20] sm:$0xff] }
   0xe   :  { %51 = vst.msk [vmem:[#allocation2] sm:$0x1] %vm50_vm0, %v49_v3  ;;  %v189_v6 = vld [vmem:[#allocation3 + $0x18] sm:$0xff]  ;;  %v188_v7 = vld [vmem:[#allocation3 + $0x10] sm:$0xff]  ;;  %v187_v8 = vld [vmem:[#allocation3 + $0x8] sm:$0xff]  ;;  %s283_s28 = smov [#allocation8]  }
   0xf   :  { %v186_v9 = vld [vmem:[#allocation3] sm:$0xff]  ;;  %v131_v12 = vld [vmem:[%s328_s2] sm:$0x1]  ;;  %s141_s29 = sshll.u32 %s283_s28, 4  ;;  %s143_s6 = sshll.u32 %s330_s4, 4  ;;  %s142_s29 = int_to_ptr.vmem [resolvable:$true] %s141_s29  ;;  %s144_s6 = int_to_ptr.hbm [resolvable:$true] %s143_s6 }
  0x10   :  { %v133_v14 = vld [vmem:[#allocation6] sm:$0x1] }
  0x11   :  { %119 = vmatpush.bf16.msra.mxu0 %v192_v2 }
  0x15   :  { %120 = vmatpush.bf16.msra.mxu0 %v191_v4  ;;  %v52_v10 = vld [vmem:[#allocation2] sm:$0x1] }
  0x16   :  { %v53_v11 = vpack.c.bf16 %v52_v10, %v52_v10 }
  0x19   :  { %121 = vmatpush.bf16.msra.mxu0 %v190_v5 }
  0x1d   :  { %122 = vmatpush.bf16.msra.mxu0 %v189_v6 }
  0x21   :  { %123 = vmatpush.bf16.msra.mxu0 %v188_v7 }
  0x25   :  { %124 = vmatpush.bf16.msra.mxu0 %v187_v8 }
  0x29   :  { %125 = vmatpush.bf16.msra.mxu0 %v186_v9 }
  0x2c   :  { %126 = vmatmul.bf16.vlgmr.msra.gmra.mxu0 %v53_v11 }
  0xa9   :  { %v127_v13 = vpop.f32.mrf.mxu0 }
  0xaa   :  { %v132_v15 = vadd.f32 %v131_v12, %v127_v13 }
  0xac   :  { %v134_v16 = vadd.f32 %v133_v14, %v132_v15 }
  0xae   :  { %135 = vst.msk [vmem:[#allocation8] sm:$0x1] %vm50_vm0, %v134_v16 }
  0xaf   :  { %146 = dma.vmem_to_hbm [thread:$0]  %s142_s29, 16, %s144_s6, [#allocation5]  }
  0xb1   :  { %v129_v17 = vpop.f32.mrf.mxu0 }
  0xb2   :  { %276 = dma.done.wait [#allocation5], 16  }
  0xb3   :  { %277 = vsyncadd [#allocation5], 4294967280 }
  0xb4   :  { %151 = vsyncpa [#allocation4], 1 }
  0xb5   :  { %152 = vsyncpa [#allocation7], 1 }
  0xb6   :  { %153 = vsyncpa [#allocation5], 1 }

</bundles_post_ra>
